<compile_context>
chip_gen: v5e
topology: v5e:2x2
jax: 0.10.0
libtpu: 0.0.40
codegen_flags: <defaults>
</compile_context>

<pallas_src>
import numpy as np
import jax
import jax.numpy as jnp
from jax import lax
from jax.experimental import pallas as pl
from jax.experimental.pallas import tpu as pltpu

B, S, CIN, COUT, K, DBR = 8, 4, 16, 32, 3, 32   # nodes(batch), seq, in, out, Cheb K, bridge
EPS = 1e-5
G4 = 4 * COUT      # 128 : four gates packed along lanes [i|f|c|o]
KC = K * COUT      # 96  : Chebyshev basis packed along lanes [Tx0|Tx1|Tx2]
BR2 = 2 * DBR      # 64  : [hidden | cell] bridge outputs packed along lanes
SC = S * COUT      # 128 : series slab lanes (t-major)
OUT_W = 256        # padded lane-dense output: [series(128) | hb|cb(64) | pad(64)]

# packed-slab row offsets ---------------------------------------------------
WB_FC2WX = 0                 # wbig rows [0, CIN)        : fc_w2 @ [Wxi|Wxf|Wxc|Wxo]
WB_CHEB  = CIN               # wbig rows [CIN, CIN+KC)   : Cheb weights (k-major rows, gate-minor cols)
WB_P     = CIN + KC          # wbig rows [.., ..+SC)     : LayerNorm block-averaging matrix
MS_LSTK  = 0                 # misc rows [0, 2B)         : [L ; 2*L@L - I]
MS_FC1   = 2 * B             # misc rows [2B, 2B+CIN)    : fc1 weight
MS_WBR   = 2 * B + CIN       # misc rows [.., ..+2*COUT) : blockdiag(Wh, Wcell)


# --------------------------------------------------------------------------- #
# Pallas kernel
# --------------------------------------------------------------------------- #
def _kernel(x_ref, wbig_ref, misc_ref, const_ref, out_ref):
    # ---- unpack packed operands (all slices sublane/lane tile aligned) -----
    fc2wx  = wbig_ref[WB_FC2WX:WB_FC2WX + CIN, :]              # (16, 128)
    cheb_w = wbig_ref[WB_CHEB:WB_CHEB + KC, :]                 # (96, 128)
    P      = wbig_ref[WB_P:WB_P + SC, :]                       # (128, 128) block-avg

    lstack = misc_ref[MS_LSTK:MS_LSTK + 2 * B, 0:B]            # (16, 8)  [L ; 2LL - I]
    fc_w1  = misc_ref[MS_FC1:MS_FC1 + CIN, 0:CIN]              # (16, 16)
    wbr    = misc_ref[MS_WBR:MS_WBR + 2 * COUT, 0:BR2]         # (64, 64)

    const = const_ref[...]                                     # (8, 128) constant slab
    # Hoist broadcasts out of the statically-unrolled loop (no CSE of
    # broadcast_in_dim).
    gate_b = jnp.broadcast_to(const[0:1, :], (B, G4))          # cheb_b + b_g + fc_b2@Wx
    ln_g   = const[1:2, :]                                     # gamma tiled x S
    ln_b   = const[2:3, :]                                     # beta  tiled x S
    wc_if  = jnp.broadcast_to(const[3:4, 0:2 * COUT], (B, 2 * COUT))   # [wc_i | wc_f]
    wc_o   = jnp.broadcast_to(const[4:5, 0:COUT], (B, COUT))
    bbr    = const[5:6, 0:BR2]                                 # [bh | bc]
    fc_b1  = const[6:7, 0:CIN]

    # ---- non-recurrent input path, hoisted (fc2 folded into fc2wx/gate_b) --
    xf = x_ref[...]                                            # (S*B, CIN), row = t*B + b
    h1 = jnp.maximum(
        jnp.dot(xf, fc_w1, preferred_element_type=jnp.float32) + fc_b1, 0.0)
    # TODO(synk): nn.Dropout skipped (inference / eval mode -> identity)
    xproj = jnp.dot(h1, fc2wx, preferred_element_type=jnp.float32)   # (S*B, 4*COUT)

    # ---- recurrent GCLSTM cell ----------------------------------------------
    H = jnp.zeros((B, COUT), jnp.float32)
    C = jnp.zeros((B, COUT), jnp.float32)
    h_list = []
    for t in range(S):
        xp = xproj[t * B:(t + 1) * B, :]                       # (8, 128), contiguous rows

        # Chebyshev basis: Tx1 = L@H and Tx2 = (2LL - I)@H in ONE stacked matmul.
        txl = jnp.dot(lstack, H, preferred_element_type=jnp.float32)        # (16, 32)
        txc = jnp.concatenate([H, txl[0:B, :], txl[B:2 * B, :]], axis=-1)   # (8, 96)

        # All four gates' pre-activations in one lane-dense matmul.
        z = xp + jnp.dot(txc, cheb_w, preferred_element_type=jnp.float32) + gate_b

        # Fused I/F sigmoid on the packed (8,64) slice.
        gif = jax.nn.sigmoid(z[:, 0:2 * COUT] + wc_if * jnp.concatenate([C, C], axis=-1))
        gi = gif[:, 0:COUT]
        gf = gif[:, COUT:2 * COUT]
        gc = jnp.tanh(z[:, 2 * COUT:3 * COUT])
        C = gf * C + gi * gc
        go = jax.nn.sigmoid(z[:, 3 * COUT:4 * COUT] + wc_o * C)
        H = go * jnp.tanh(C)
        h_list.append(H)                                       # raw H; LN hoisted below

    # ---- LayerNorm hoisted out of the loop ----------------------------------
    # Segmented (per-timestep) stats on the (8, S*COUT) slab via the block-
    # averaging matrix P (MXU); two-pass form to avoid cancellation.
    hslab = jnp.concatenate(h_list, axis=-1)                   # (8, 128)
    mean = jnp.dot(hslab, P, preferred_element_type=jnp.float32)
    cent = hslab - mean
    var = jnp.dot(cent * cent, P, preferred_element_type=jnp.float32)
    series = cent * lax.rsqrt(var + EPS) * ln_g + ln_b         # (8, 128)

    # ---- bridges: [H | C] @ blockdiag(Wh, Wcell), tanh on the hidden half ---
    hc = jnp.dot(jnp.concatenate([H, C], axis=-1), wbr,
                 preferred_element_type=jnp.float32) + bbr     # (8, 64)
    is_hidden = lax.broadcasted_iota(jnp.int32, (B, BR2), 1) < DBR
    hcb = jnp.where(is_hidden, jnp.tanh(hc), hc)

    # ---- single lane-dense (8, 256) output store ----------------------------
    out_ref[...] = jnp.concatenate(
        [series, hcb, jnp.zeros((B, OUT_W - SC - BR2), jnp.float32)], axis=-1)


# --------------------------------------------------------------------------- #
# Host-side parameter packing + pallas_call wrapper
# --------------------------------------------------------------------------- #
def _pad_lanes(a, width=128):
    return jnp.pad(a, ((0, 0), (0, width - a.shape[1])))


def _pack_params(lhat, p):
    hp = lax.Precision.HIGHEST   # host-side pre-folds at full f32 precision

    # Gate input projections packed by gate, with fc2 folded in.
    wx_cat = jnp.concatenate([p["wx"][g] for g in range(4)], axis=-1)        # (CIN, 128)
    fc2wx = jnp.dot(p["fc_w2"], wx_cat, precision=hp)                        # (CIN, 128)

    # Cheb weights: rows grouped by order k, columns grouped by gate g.
    cheb_w = jnp.concatenate(
        [jnp.concatenate([p["cheb_w"][g][k] for g in range(4)], axis=-1)
         for k in range(K)], axis=0)                                         # (KC, 128)

    # LayerNorm block-averaging matrix: P[j,k] = (j//COUT == k//COUT)/COUT.
    blk = np.repeat(np.arange(S), COUT)
    P = jnp.asarray((blk[:, None] == blk[None, :]).astype(np.float32) / COUT)

    wbig = jnp.concatenate([fc2wx, cheb_w, P], axis=0)                       # (240, 128)

    # Stacked Laplacian [L ; 2*L@L - I], fc1 weight, block-diag bridge weight.
    L2 = 2.0 * jnp.dot(lhat, lhat, precision=hp) - jnp.eye(B, dtype=jnp.float32)
    lstack = jnp.concatenate([lhat, L2], axis=0)                             # (16, 8)
    zero = jnp.zeros((COUT, DBR), jnp.float32)
    wbr = jnp.concatenate(
        [jnp.concatenate([p["wh"], zero], axis=-1),
         jnp.concatenate([zero, p["wcell"]], axis=-1)], axis=0)              # (64, 64)
    misc = jnp.concatenate(
        [_pad_lanes(lstack), _pad_lanes(p["fc_w1"]), _pad_lanes(wbr)], axis=0)  # (96, 128)

    # Single (8,128) constant slab; all sub-tile constants start at lane 0.
    gate_b = (jnp.concatenate([p["cheb_b"][g] + p["b_g"][g] for g in range(4)], axis=-1)
              + jnp.dot(p["fc_b2"], wx_cat, precision=hp))                   # (1, 128)
    const = jnp.concatenate([
        _pad_lanes(gate_b),                                                  # row 0
        _pad_lanes(jnp.tile(p["ln_g"], (1, S))),                             # row 1
        _pad_lanes(jnp.tile(p["ln_b"], (1, S))),                             # row 2
        _pad_lanes(jnp.concatenate([p["w_c"][0], p["w_c"][1]], axis=-1)),    # row 3
        _pad_lanes(p["w_c"][2]),                                             # row 4
        _pad_lanes(jnp.concatenate([p["bh"], p["bc"]], axis=-1)),            # row 5
        _pad_lanes(p["fc_b1"]),                                              # row 6
        jnp.zeros((1, 128), jnp.float32),                                    # row 7
    ], axis=0)                                                               # (8, 128)
    return wbig, misc, const


def inundation_gclstm_block(x, lhat, params):
    # Time-major flat input: row index = t*B + b, so each timestep is a
    # contiguous 8-row (one sublane tile) slice inside the kernel.
    x_tb = jnp.transpose(x, (1, 0, 2)).reshape(S * B, CIN)
    wbig, misc, const = _pack_params(lhat, params)
    vmem = pl.BlockSpec(memory_space=pltpu.MemorySpace.VMEM)
    out = pl.pallas_call(
        _kernel,
        out_shape=jax.ShapeDtypeStruct((B, OUT_W), jnp.float32),
        in_specs=[vmem, vmem, vmem, vmem],
        out_specs=vmem,
    )(x_tb, wbig, misc, const)
    series = out[:, :SC].reshape(B, S, COUT)
    hb = out[:, SC:SC + DBR]
    cb = out[:, SC + DBR:SC + BR2]
    return series, hb, cb


# --------------------------------------------------------------------------- #
# Pure-JAX reference (mirrors the PyTorch module; uses the unpacked params)
# --------------------------------------------------------------------------- #
def _cheb_ref(L, H, W, b):
    Tx0 = H
    out = jnp.dot(Tx0, W[0], preferred_element_type=jnp.float32)
    Tx1 = jnp.dot(L, Tx0, preferred_element_type=jnp.float32)
    out = out + jnp.dot(Tx1, W[1], preferred_element_type=jnp.float32)
    for k in range(2, K):
        Tx2 = 2.0 * jnp.dot(L, Tx1, preferred_element_type=jnp.float32) - Tx0
        out = out + jnp.dot(Tx2, W[k], preferred_element_type=jnp.float32)
        Tx0, Tx1 = Tx1, Tx2
    return out + b


def _forward_ref(x, lhat, p):
    Wx, CW, CB, WC, BG = p["wx"], p["cheb_w"], p["cheb_b"], p["w_c"], p["b_g"]
    H = jnp.zeros((B, COUT), jnp.float32)
    C = jnp.zeros((B, COUT), jnp.float32)
    hs = []
    for t in range(S):
        xt = x[:, t, :]
        xt = jnp.maximum(
            jnp.dot(xt, p["fc_w1"], preferred_element_type=jnp.float32) + p["fc_b1"], 0.0)
        xt = jnp.dot(xt, p["fc_w2"], preferred_element_type=jnp.float32) + p["fc_b2"]
        I = jax.nn.sigmoid(jnp.dot(xt, Wx[0], preferred_element_type=jnp.float32)
                           + _cheb_ref(lhat, H, CW[0], CB[0]) + WC[0] * C + BG[0])
        F = jax.nn.sigmoid(jnp.dot(xt, Wx[1], preferred_element_type=jnp.float32)
                           + _cheb_ref(lhat, H, CW[1], CB[1]) + WC[1] * C + BG[1])
        T = jnp.tanh(jnp.dot(xt, Wx[2], preferred_element_type=jnp.float32)
                     + _cheb_ref(lhat, H, CW[2], CB[2]) + BG[2])
        C = F * C + I * T
        O = jax.nn.sigmoid(jnp.dot(xt, Wx[3], preferred_element_type=jnp.float32)
                           + _cheb_ref(lhat, H, CW[3], CB[3]) + WC[2] * C + BG[3])
        H = O * jnp.tanh(C)
        hs.append(H)
    series = jnp.stack(hs, axis=1)
    mean = series.mean(-1, keepdims=True)
    var = ((series - mean) ** 2).mean(-1, keepdims=True)
    series = (series - mean) * lax.rsqrt(var + EPS) * p["ln_g"] + p["ln_b"]
    hb = jnp.tanh(jnp.dot(H, p["wh"], preferred_element_type=jnp.float32) + p["bh"])
    cb = jnp.dot(C, p["wcell"], preferred_element_type=jnp.float32) + p["bc"]
    return series, hb, cb


# --------------------------------------------------------------------------- #
# Glue / test harness
# --------------------------------------------------------------------------- #
def scaled_laplacian(edge_index, num_nodes):
    """Dense L_hat = -D^{-1/2} A D^{-1/2} (sym norm, lambda_max = 2)."""
    src, dst = edge_index
    A = jnp.zeros((num_nodes, num_nodes), jnp.float32).at[dst, src].add(1.0)
    deg = A.sum(axis=1)
    dinv = jnp.where(deg > 0, 1.0 / jnp.sqrt(deg), 0.0)
    return -(dinv[:, None] * A * dinv[None, :])


def init_params(key):
    ks = jax.random.split(key, 13)

    def w(k, shape, scale=0.1):
        return (scale * jax.random.normal(k, shape)).astype(jnp.float32)

    return {
        "fc_w1": w(ks[0], (CIN, CIN)),   "fc_b1": w(ks[1], (1, CIN)),
        "fc_w2": w(ks[2], (CIN, CIN)),   "fc_b2": w(ks[3], (1, CIN)),
        "wx":     w(ks[4], (4, CIN, COUT)),          # W_i, W_f, W_c, W_o
        "cheb_w": w(ks[5], (4, K, COUT, COUT)),      # conv_{i,f,c,o} Cheb weights
        "cheb_b": w(ks[6], (4, 1, COUT)),            # conv_{i,f,c,o} biases
        "w_c":    w(ks[7], (3, 1, COUT)),            # peepholes w_c_{i,f,o}
        "b_g":    w(ks[8], (4, 1, COUT)),            # b_{i,f,c,o}
        "ln_g":  jnp.ones((1, COUT), jnp.float32),
        "ln_b":  jnp.zeros((1, COUT), jnp.float32),
        "wh":    w(ks[9], (COUT, DBR)),  "bh": w(ks[10], (1, DBR)),
        "wcell": w(ks[11], (COUT, DBR)), "bc": w(ks[12], (1, DBR)),
    }


if __name__ == "__main__":
    key = jax.random.PRNGKey(0)
    kx, kp = jax.random.split(key)
    x = jax.random.normal(kx, (B, S, CIN), dtype=jnp.float32)

    # Bidirectional ring graph over the B "nodes" (the batch dim is the graph-
    # node dim, matching gclstm(inputs[:, t], edges, ...) in the PyTorch code).
    idx = np.arange(B)
    src = np.concatenate([idx, (idx + 1) % B])
    dst = np.concatenate([(idx + 1) % B, idx])
    edge_index = jnp.asarray(np.stack([src, dst]), dtype=jnp.int32)
    lhat = scaled_laplacian(edge_index, B)

    params = init_params(kp)

    series, hb, cb = jax.block_until_ready(inundation_gclstm_block(x, lhat, params))

    # Pure-JAX reference for correctness.
    ref_series, ref_hb, ref_cb = _forward_ref(x, lhat, params)
    np.testing.assert_allclose(np.asarray(series), np.asarray(ref_series), rtol=1e-4, atol=1e-4)
    np.testing.assert_allclose(np.asarray(hb), np.asarray(ref_hb), rtol=1e-4, atol=1e-4)
    np.testing.assert_allclose(np.asarray(cb), np.asarray(ref_cb), rtol=1e-4, atol=1e-4)

    print("KERNEL_OK")
</pallas_src>

<mosaic_0001>
module attributes {stable_mosaic.version = 11 : i64} {
  func.func @_kernel(%arg0: memref<32x16xf32, #tpu.memory_space<vmem>>, %arg1: memref<240x128xf32, #tpu.memory_space<vmem>>, %arg2: memref<96x128xf32, #tpu.memory_space<vmem>>, %arg3: memref<8x128xf32, #tpu.memory_space<vmem>>, %arg4: memref<8x256xf32, #tpu.memory_space<vmem>>) attributes {dimension_semantics = [], scalar_prefetch = 0 : i64, scratch_operands = 0 : i64, tpu.core_type = #tpu.core_type<tc>} {
    %c0 = arith.constant 0 : index
    %c0_0 = arith.constant 0 : index
    %0 = vector.load %arg1[%c0, %c0_0] : memref<240x128xf32, #tpu.memory_space<vmem>>, vector<16x128xf32>
    %c16 = arith.constant 16 : index
    %c0_1 = arith.constant 0 : index
    %1 = vector.load %arg1[%c16, %c0_1] : memref<240x128xf32, #tpu.memory_space<vmem>>, vector<96x128xf32>
    %c112 = arith.constant 112 : index
    %c0_2 = arith.constant 0 : index
    %2 = vector.load %arg1[%c112, %c0_2] : memref<240x128xf32, #tpu.memory_space<vmem>>, vector<128x128xf32>
    %c0_3 = arith.constant 0 : index
    %c0_4 = arith.constant 0 : index
    %3 = vector.load %arg2[%c0_3, %c0_4] : memref<96x128xf32, #tpu.memory_space<vmem>>, vector<16x8xf32>
    %c16_5 = arith.constant 16 : index
    %c0_6 = arith.constant 0 : index
    %4 = vector.load %arg2[%c16_5, %c0_6] : memref<96x128xf32, #tpu.memory_space<vmem>>, vector<16x16xf32>
    %c32 = arith.constant 32 : index
    %c0_7 = arith.constant 0 : index
    %5 = vector.load %arg2[%c32, %c0_7] : memref<96x128xf32, #tpu.memory_space<vmem>>, vector<64x64xf32>
    %c0_8 = arith.constant 0 : index
    %c0_9 = arith.constant 0 : index
    %6 = vector.load %arg3[%c0_8, %c0_9] : memref<8x128xf32, #tpu.memory_space<vmem>>, vector<8x128xf32>
    %7 = vector.extract_strided_slice %6 {offsets = [0, 0], sizes = [1, 128], strides = [1, 1]} : vector<8x128xf32> to vector<1x128xf32>
    %8 = vector.shape_cast %7 : vector<1x128xf32> to vector<1x128xf32>
    %9 = vector.broadcast %8 : vector<1x128xf32> to vector<8x128xf32>
    %10 = vector.extract_strided_slice %6 {offsets = [1, 0], sizes = [1, 128], strides = [1, 1]} : vector<8x128xf32> to vector<1x128xf32>
    %11 = vector.extract_strided_slice %6 {offsets = [2, 0], sizes = [1, 128], strides = [1, 1]} : vector<8x128xf32> to vector<1x128xf32>
    %12 = vector.extract_strided_slice %6 {offsets = [3, 0], sizes = [1, 64], strides = [1, 1]} : vector<8x128xf32> to vector<1x64xf32>
    %13 = vector.shape_cast %12 : vector<1x64xf32> to vector<1x64xf32>
    %14 = vector.broadcast %13 : vector<1x64xf32> to vector<8x64xf32>
    %15 = vector.extract_strided_slice %6 {offsets = [4, 0], sizes = [1, 32], strides = [1, 1]} : vector<8x128xf32> to vector<1x32xf32>
    %16 = vector.shape_cast %15 : vector<1x32xf32> to vector<1x32xf32>
    %17 = vector.broadcast %16 : vector<1x32xf32> to vector<8x32xf32>
    %18 = vector.extract_strided_slice %6 {offsets = [5, 0], sizes = [1, 64], strides = [1, 1]} : vector<8x128xf32> to vector<1x64xf32>
    %19 = vector.extract_strided_slice %6 {offsets = [6, 0], sizes = [1, 16], strides = [1, 1]} : vector<8x128xf32> to vector<1x16xf32>
    %c0_10 = arith.constant 0 : index
    %c0_11 = arith.constant 0 : index
    %20 = vector.load %arg0[%c0_10, %c0_11] : memref<32x16xf32, #tpu.memory_space<vmem>>, vector<32x16xf32>
    %cst = arith.constant dense<0.000000e+00> : vector<32x16xf32>
    %21 = tpu.matmul %20, %4, %cst {dimension_numbers = #tpu.dot_dimension_numbers<[1], [0], [0], [1], [0, 0, 1, 1], [], []>} : vector<32x16xf32>, vector<16x16xf32>, vector<32x16xf32> -> vector<32x16xf32>
    %22 = vector.broadcast %19 : vector<1x16xf32> to vector<32x16xf32>
    %23 = arith.addf %21, %22 : vector<32x16xf32>
    %cst_12 = arith.constant 0.000000e+00 : f32
    %24 = vector.broadcast %cst_12 : f32 to vector<32x16xf32>
    %25 = arith.maximumf %23, %24 : vector<32x16xf32>
    %cst_13 = arith.constant dense<0.000000e+00> : vector<32x128xf32>
    %26 = tpu.matmul %25, %0, %cst_13 {dimension_numbers = #tpu.dot_dimension_numbers<[1], [0], [0], [1], [0, 0, 1, 1], [], []>} : vector<32x16xf32>, vector<16x128xf32>, vector<32x128xf32> -> vector<32x128xf32>
    %cst_14 = arith.constant 0.000000e+00 : f32
    %27 = vector.broadcast %cst_14 : f32 to vector<8x32xf32>
    %cst_15 = arith.constant 0.000000e+00 : f32
    %28 = vector.broadcast %cst_15 : f32 to vector<8x32xf32>
    %29 = vector.extract_strided_slice %26 {offsets = [0, 0], sizes = [8, 128], strides = [1, 1]} : vector<32x128xf32> to vector<8x128xf32>
    %cst_16 = arith.constant dense<0.000000e+00> : vector<16x32xf32>
    %30 = tpu.matmul %3, %27, %cst_16 {dimension_numbers = #tpu.dot_dimension_numbers<[1], [0], [0], [1], [0, 0, 1, 1], [], []>} : vector<16x8xf32>, vector<8x32xf32>, vector<16x32xf32> -> vector<16x32xf32>
    %31 = vector.extract_strided_slice %30 {offsets = [0, 0], sizes = [8, 32], strides = [1, 1]} : vector<16x32xf32> to vector<8x32xf32>
    %32 = vector.extract_strided_slice %30 {offsets = [8, 0], sizes = [8, 32], strides = [1, 1]} : vector<16x32xf32> to vector<8x32xf32>
    %33 = tpu.concatenate %27, %31, %32 in 1 : vector<8x32xf32>, vector<8x32xf32>, vector<8x32xf32> -> vector<8x96xf32>
    %cst_17 = arith.constant dense<0.000000e+00> : vector<8x128xf32>
    %34 = tpu.matmul %33, %1, %cst_17 {dimension_numbers = #tpu.dot_dimension_numbers<[1], [0], [0], [1], [0, 0, 1, 1], [], []>} : vector<8x96xf32>, vector<96x128xf32>, vector<8x128xf32> -> vector<8x128xf32>
    %35 = arith.addf %29, %34 : vector<8x128xf32>
    %36 = arith.addf %35, %9 : vector<8x128xf32>
    %37 = vector.extract_strided_slice %36 {offsets = [0, 0], sizes = [8, 64], strides = [1, 1]} : vector<8x128xf32> to vector<8x64xf32>
    %38 = tpu.concatenate %28, %28 in 1 : vector<8x32xf32>, vector<8x32xf32> -> vector<8x64xf32>
    %39 = arith.mulf %14, %38 : vector<8x64xf32>
    %40 = arith.addf %37, %39 : vector<8x64xf32>
    %41 = arith.negf %40 : vector<8x64xf32>
    %42 = math.exp %41 : vector<8x64xf32>
    %cst_18 = arith.constant 1.000000e+00 : f32
    %43 = vector.broadcast %cst_18 : f32 to vector<8x64xf32>
    %44 = arith.addf %43, %42 : vector<8x64xf32>
    %45 = arith.divf %43, %44 : vector<8x64xf32>
    %46 = vector.extract_strided_slice %45 {offsets = [0, 0], sizes = [8, 32], strides = [1, 1]} : vector<8x64xf32> to vector<8x32xf32>
    %47 = vector.extract_strided_slice %45 {offsets = [0, 32], sizes = [8, 32], strides = [1, 1]} : vector<8x64xf32> to vector<8x32xf32>
    %48 = vector.extract_strided_slice %36 {offsets = [0, 64], sizes = [8, 32], strides = [1, 1]} : vector<8x128xf32> to vector<8x32xf32>
    %49 = math.tanh %48 : vector<8x32xf32>
    %50 = arith.mulf %47, %28 : vector<8x32xf32>
    %51 = arith.mulf %46, %49 : vector<8x32xf32>
    %52 = arith.addf %50, %51 : vector<8x32xf32>
    %53 = vector.extract_strided_slice %36 {offsets = [0, 96], sizes = [8, 32], strides = [1, 1]} : vector<8x128xf32> to vector<8x32xf32>
    %54 = arith.mulf %17, %52 : vector<8x32xf32>
    %55 = arith.addf %53, %54 : vector<8x32xf32>
    %56 = arith.negf %55 : vector<8x32xf32>
    %57 = math.exp %56 : vector<8x32xf32>
    %cst_19 = arith.constant 1.000000e+00 : f32
    %58 = vector.broadcast %cst_19 : f32 to vector<8x32xf32>
    %59 = arith.addf %58, %57 : vector<8x32xf32>
    %60 = arith.divf %58, %59 : vector<8x32xf32>
    %61 = math.tanh %52 : vector<8x32xf32>
    %62 = arith.mulf %60, %61 : vector<8x32xf32>
    %63 = vector.extract_strided_slice %26 {offsets = [8, 0], sizes = [8, 128], strides = [1, 1]} : vector<32x128xf32> to vector<8x128xf32>
    %cst_20 = arith.constant dense<0.000000e+00> : vector<16x32xf32>
    %64 = tpu.matmul %3, %62, %cst_20 {dimension_numbers = #tpu.dot_dimension_numbers<[1], [0], [0], [1], [0, 0, 1, 1], [], []>} : vector<16x8xf32>, vector<8x32xf32>, vector<16x32xf32> -> vector<16x32xf32>
    %65 = vector.extract_strided_slice %64 {offsets = [0, 0], sizes = [8, 32], strides = [1, 1]} : vector<16x32xf32> to vector<8x32xf32>
    %66 = vector.extract_strided_slice %64 {offsets = [8, 0], sizes = [8, 32], strides = [1, 1]} : vector<16x32xf32> to vector<8x32xf32>
    %67 = tpu.concatenate %62, %65, %66 in 1 : vector<8x32xf32>, vector<8x32xf32>, vector<8x32xf32> -> vector<8x96xf32>
    %cst_21 = arith.constant dense<0.000000e+00> : vector<8x128xf32>
    %68 = tpu.matmul %67, %1, %cst_21 {dimension_numbers = #tpu.dot_dimension_numbers<[1], [0], [0], [1], [0, 0, 1, 1], [], []>} : vector<8x96xf32>, vector<96x128xf32>, vector<8x128xf32> -> vector<8x128xf32>
    %69 = arith.addf %63, %68 : vector<8x128xf32>
    %70 = arith.addf %69, %9 : vector<8x128xf32>
    %71 = vector.extract_strided_slice %70 {offsets = [0, 0], sizes = [8, 64], strides = [1, 1]} : vector<8x128xf32> to vector<8x64xf32>
    %72 = tpu.concatenate %52, %52 in 1 : vector<8x32xf32>, vector<8x32xf32> -> vector<8x64xf32>
    %73 = arith.mulf %14, %72 : vector<8x64xf32>
    %74 = arith.addf %71, %73 : vector<8x64xf32>
    %75 = arith.negf %74 : vector<8x64xf32>
    %76 = math.exp %75 : vector<8x64xf32>
    %cst_22 = arith.constant 1.000000e+00 : f32
    %77 = vector.broadcast %cst_22 : f32 to vector<8x64xf32>
    %78 = arith.addf %77, %76 : vector<8x64xf32>
    %79 = arith.divf %77, %78 : vector<8x64xf32>
    %80 = vector.extract_strided_slice %79 {offsets = [0, 0], sizes = [8, 32], strides = [1, 1]} : vector<8x64xf32> to vector<8x32xf32>
    %81 = vector.extract_strided_slice %79 {offsets = [0, 32], sizes = [8, 32], strides = [1, 1]} : vector<8x64xf32> to vector<8x32xf32>
    %82 = vector.extract_strided_slice %70 {offsets = [0, 64], sizes = [8, 32], strides = [1, 1]} : vector<8x128xf32> to vector<8x32xf32>
    %83 = math.tanh %82 : vector<8x32xf32>
    %84 = arith.mulf %81, %52 : vector<8x32xf32>
    %85 = arith.mulf %80, %83 : vector<8x32xf32>
    %86 = arith.addf %84, %85 : vector<8x32xf32>
    %87 = vector.extract_strided_slice %70 {offsets = [0, 96], sizes = [8, 32], strides = [1, 1]} : vector<8x128xf32> to vector<8x32xf32>
    %88 = arith.mulf %17, %86 : vector<8x32xf32>
    %89 = arith.addf %87, %88 : vector<8x32xf32>
    %90 = arith.negf %89 : vector<8x32xf32>
    %91 = math.exp %90 : vector<8x32xf32>
    %cst_23 = arith.constant 1.000000e+00 : f32
    %92 = vector.broadcast %cst_23 : f32 to vector<8x32xf32>
    %93 = arith.addf %92, %91 : vector<8x32xf32>
    %94 = arith.divf %92, %93 : vector<8x32xf32>
    %95 = math.tanh %86 : vector<8x32xf32>
    %96 = arith.mulf %94, %95 : vector<8x32xf32>
    %97 = vector.extract_strided_slice %26 {offsets = [16, 0], sizes = [8, 128], strides = [1, 1]} : vector<32x128xf32> to vector<8x128xf32>
    %cst_24 = arith.constant dense<0.000000e+00> : vector<16x32xf32>
    %98 = tpu.matmul %3, %96, %cst_24 {dimension_numbers = #tpu.dot_dimension_numbers<[1], [0], [0], [1], [0, 0, 1, 1], [], []>} : vector<16x8xf32>, vector<8x32xf32>, vector<16x32xf32> -> vector<16x32xf32>
    %99 = vector.extract_strided_slice %98 {offsets = [0, 0], sizes = [8, 32], strides = [1, 1]} : vector<16x32xf32> to vector<8x32xf32>
    %100 = vector.extract_strided_slice %98 {offsets = [8, 0], sizes = [8, 32], strides = [1, 1]} : vector<16x32xf32> to vector<8x32xf32>
    %101 = tpu.concatenate %96, %99, %100 in 1 : vector<8x32xf32>, vector<8x32xf32>, vector<8x32xf32> -> vector<8x96xf32>
    %cst_25 = arith.constant dense<0.000000e+00> : vector<8x128xf32>
    %102 = tpu.matmul %101, %1, %cst_25 {dimension_numbers = #tpu.dot_dimension_numbers<[1], [0], [0], [1], [0, 0, 1, 1], [], []>} : vector<8x96xf32>, vector<96x128xf32>, vector<8x128xf32> -> vector<8x128xf32>
    %103 = arith.addf %97, %102 : vector<8x128xf32>
    %104 = arith.addf %103, %9 : vector<8x128xf32>
    %105 = vector.extract_strided_slice %104 {offsets = [0, 0], sizes = [8, 64], strides = [1, 1]} : vector<8x128xf32> to vector<8x64xf32>
    %106 = tpu.concatenate %86, %86 in 1 : vector<8x32xf32>, vector<8x32xf32> -> vector<8x64xf32>
    %107 = arith.mulf %14, %106 : vector<8x64xf32>
    %108 = arith.addf %105, %107 : vector<8x64xf32>
    %109 = arith.negf %108 : vector<8x64xf32>
    %110 = math.exp %109 : vector<8x64xf32>
    %cst_26 = arith.constant 1.000000e+00 : f32
    %111 = vector.broadcast %cst_26 : f32 to vector<8x64xf32>
    %112 = arith.addf %111, %110 : vector<8x64xf32>
    %113 = arith.divf %111, %112 : vector<8x64xf32>
    %114 = vector.extract_strided_slice %113 {offsets = [0, 0], sizes = [8, 32], strides = [1, 1]} : vector<8x64xf32> to vector<8x32xf32>
    %115 = vector.extract_strided_slice %113 {offsets = [0, 32], sizes = [8, 32], strides = [1, 1]} : vector<8x64xf32> to vector<8x32xf32>
    %116 = vector.extract_strided_slice %104 {offsets = [0, 64], sizes = [8, 32], strides = [1, 1]} : vector<8x128xf32> to vector<8x32xf32>
    %117 = math.tanh %116 : vector<8x32xf32>
    %118 = arith.mulf %115, %86 : vector<8x32xf32>
    %119 = arith.mulf %114, %117 : vector<8x32xf32>
    %120 = arith.addf %118, %119 : vector<8x32xf32>
    %121 = vector.extract_strided_slice %104 {offsets = [0, 96], sizes = [8, 32], strides = [1, 1]} : vector<8x128xf32> to vector<8x32xf32>
    %122 = arith.mulf %17, %120 : vector<8x32xf32>
    %123 = arith.addf %121, %122 : vector<8x32xf32>
    %124 = arith.negf %123 : vector<8x32xf32>
    %125 = math.exp %124 : vector<8x32xf32>
    %cst_27 = arith.constant 1.000000e+00 : f32
    %126 = vector.broadcast %cst_27 : f32 to vector<8x32xf32>
    %127 = arith.addf %126, %125 : vector<8x32xf32>
    %128 = arith.divf %126, %127 : vector<8x32xf32>
    %129 = math.tanh %120 : vector<8x32xf32>
    %130 = arith.mulf %128, %129 : vector<8x32xf32>
    %131 = vector.extract_strided_slice %26 {offsets = [24, 0], sizes = [8, 128], strides = [1, 1]} : vector<32x128xf32> to vector<8x128xf32>
    %cst_28 = arith.constant dense<0.000000e+00> : vector<16x32xf32>
    %132 = tpu.matmul %3, %130, %cst_28 {dimension_numbers = #tpu.dot_dimension_numbers<[1], [0], [0], [1], [0, 0, 1, 1], [], []>} : vector<16x8xf32>, vector<8x32xf32>, vector<16x32xf32> -> vector<16x32xf32>
    %133 = vector.extract_strided_slice %132 {offsets = [0, 0], sizes = [8, 32], strides = [1, 1]} : vector<16x32xf32> to vector<8x32xf32>
    %134 = vector.extract_strided_slice %132 {offsets = [8, 0], sizes = [8, 32], strides = [1, 1]} : vector<16x32xf32> to vector<8x32xf32>
    %135 = tpu.concatenate %130, %133, %134 in 1 : vector<8x32xf32>, vector<8x32xf32>, vector<8x32xf32> -> vector<8x96xf32>
    %cst_29 = arith.constant dense<0.000000e+00> : vector<8x128xf32>
    %136 = tpu.matmul %135, %1, %cst_29 {dimension_numbers = #tpu.dot_dimension_numbers<[1], [0], [0], [1], [0, 0, 1, 1], [], []>} : vector<8x96xf32>, vector<96x128xf32>, vector<8x128xf32> -> vector<8x128xf32>
    %137 = arith.addf %131, %136 : vector<8x128xf32>
    %138 = arith.addf %137, %9 : vector<8x128xf32>
    %139 = vector.extract_strided_slice %138 {offsets = [0, 0], sizes = [8, 64], strides = [1, 1]} : vector<8x128xf32> to vector<8x64xf32>
    %140 = tpu.concatenate %120, %120 in 1 : vector<8x32xf32>, vector<8x32xf32> -> vector<8x64xf32>
    %141 = arith.mulf %14, %140 : vector<8x64xf32>
    %142 = arith.addf %139, %141 : vector<8x64xf32>
    %143 = arith.negf %142 : vector<8x64xf32>
    %144 = math.exp %143 : vector<8x64xf32>
    %cst_30 = arith.constant 1.000000e+00 : f32
    %145 = vector.broadcast %cst_30 : f32 to vector<8x64xf32>
    %146 = arith.addf %145, %144 : vector<8x64xf32>
    %147 = arith.divf %145, %146 : vector<8x64xf32>
    %148 = vector.extract_strided_slice %147 {offsets = [0, 0], sizes = [8, 32], strides = [1, 1]} : vector<8x64xf32> to vector<8x32xf32>
    %149 = vector.extract_strided_slice %147 {offsets = [0, 32], sizes = [8, 32], strides = [1, 1]} : vector<8x64xf32> to vector<8x32xf32>
    %150 = vector.extract_strided_slice %138 {offsets = [0, 64], sizes = [8, 32], strides = [1, 1]} : vector<8x128xf32> to vector<8x32xf32>
    %151 = math.tanh %150 : vector<8x32xf32>
    %152 = arith.mulf %149, %120 : vector<8x32xf32>
    %153 = arith.mulf %148, %151 : vector<8x32xf32>
    %154 = arith.addf %152, %153 : vector<8x32xf32>
    %155 = vector.extract_strided_slice %138 {offsets = [0, 96], sizes = [8, 32], strides = [1, 1]} : vector<8x128xf32> to vector<8x32xf32>
    %156 = arith.mulf %17, %154 : vector<8x32xf32>
    %157 = arith.addf %155, %156 : vector<8x32xf32>
    %158 = arith.negf %157 : vector<8x32xf32>
    %159 = math.exp %158 : vector<8x32xf32>
    %cst_31 = arith.constant 1.000000e+00 : f32
    %160 = vector.broadcast %cst_31 : f32 to vector<8x32xf32>
    %161 = arith.addf %160, %159 : vector<8x32xf32>
    %162 = arith.divf %160, %161 : vector<8x32xf32>
    %163 = math.tanh %154 : vector<8x32xf32>
    %164 = arith.mulf %162, %163 : vector<8x32xf32>
    %165 = tpu.concatenate %62, %96, %130, %164 in 1 : vector<8x32xf32>, vector<8x32xf32>, vector<8x32xf32>, vector<8x32xf32> -> vector<8x128xf32>
    %cst_32 = arith.constant dense<0.000000e+00> : vector<8x128xf32>
    %166 = tpu.matmul %165, %2, %cst_32 {dimension_numbers = #tpu.dot_dimension_numbers<[1], [0], [0], [1], [0, 0, 1, 1], [], []>} : vector<8x128xf32>, vector<128x128xf32>, vector<8x128xf32> -> vector<8x128xf32>
    %167 = arith.subf %165, %166 : vector<8x128xf32>
    %168 = arith.mulf %167, %167 : vector<8x128xf32>
    %cst_33 = arith.constant dense<0.000000e+00> : vector<8x128xf32>
    %169 = tpu.matmul %168, %2, %cst_33 {dimension_numbers = #tpu.dot_dimension_numbers<[1], [0], [0], [1], [0, 0, 1, 1], [], []>} : vector<8x128xf32>, vector<128x128xf32>, vector<8x128xf32> -> vector<8x128xf32>
    %cst_34 = arith.constant 9.99999974E-6 : f32
    %170 = vector.broadcast %cst_34 : f32 to vector<8x128xf32>
    %171 = arith.addf %169, %170 : vector<8x128xf32>
    %172 = math.rsqrt %171 : vector<8x128xf32>
    %173 = arith.mulf %167, %172 : vector<8x128xf32>
    %174 = vector.broadcast %10 : vector<1x128xf32> to vector<8x128xf32>
    %175 = arith.mulf %173, %174 : vector<8x128xf32>
    %176 = vector.broadcast %11 : vector<1x128xf32> to vector<8x128xf32>
    %177 = arith.addf %175, %176 : vector<8x128xf32>
    %178 = tpu.concatenate %164, %154 in 1 : vector<8x32xf32>, vector<8x32xf32> -> vector<8x64xf32>
    %cst_35 = arith.constant dense<0.000000e+00> : vector<8x64xf32>
    %179 = tpu.matmul %178, %5, %cst_35 {dimension_numbers = #tpu.dot_dimension_numbers<[1], [0], [0], [1], [0, 0, 1, 1], [], []>} : vector<8x64xf32>, vector<64x64xf32>, vector<8x64xf32> -> vector<8x64xf32>
    %180 = vector.broadcast %18 : vector<1x64xf32> to vector<8x64xf32>
    %181 = arith.addf %179, %180 : vector<8x64xf32>
    %182 = tpu.iota {dimensions = array<i32: 1>} : vector<8x64xi32>
    %c32_i32 = arith.constant 32 : i32
    %183 = vector.broadcast %c32_i32 : i32 to vector<8x64xi32>
    %184 = arith.cmpi slt, %182, %183 : vector<8x64xi32>
    %185 = math.tanh %181 : vector<8x64xf32>
    %186 = arith.select %184, %185, %181 : vector<8x64xi1>, vector<8x64xf32>
    %cst_36 = arith.constant 0.000000e+00 : f32
    %187 = vector.broadcast %cst_36 : f32 to vector<8x64xf32>
    %188 = tpu.concatenate %177, %186, %187 in 1 : vector<8x128xf32>, vector<8x64xf32>, vector<8x64xf32> -> vector<8x256xf32>
    %c0_37 = arith.constant 0 : index
    %c0_38 = arith.constant 0 : index
    %189 = vector.load %arg4[%c0_37, %c0_38] : memref<8x256xf32, #tpu.memory_space<vmem>>, vector<8x256xf32>
    tpu.vector_store %arg4[%c0_37, %c0_38], %188 {strides = array<i32>} : memref<8x256xf32, #tpu.memory_space<vmem>>, vector<8x256xf32>,
    return
  }
}

</mosaic_0001>

<bundles_post_ra>
// kernel: tpu_custom_call.1
= control target key start
LH: loop header
LB: loop body
LE: loop exit
PB: predicated region body
PF: predicated region fallthrough
CT: control target
= control target key end

     0   :  { %9 = vsyncpa [#allocation3], 0  ;;  %s1288_s0 = inlined_call_operand.vmem [shape: f32[32,16], index: 0, kind: input, shape index: {}]   ;;  %s1289_s1 = inlined_call_operand.hbm [shape: f32[240,128], index: 1, kind: input, shape index: {}]   ;;  %s1290_s2 = inlined_call_operand.hbm [shape: f32[96,128], index: 2, kind: input, shape index: {}]   ;;  %s1291_s3 = inlined_call_operand.vmem [shape: f32[8,128], index: 3, kind: input, shape index: {}]   ;;  %s1292_s4 = inlined_call_operand.hbm [shape: f32[8,256], index: 4, kind: output, shape index: {}]  }
   0x1   :  { %10 = vsyncpa [#allocation6], 0 }
   0x2   :  { %11 = vsyncpa [#allocation4], 0  ;;  %s18_s17 = sshll.u32 %s1289_s1, 4  ;;  %s1008_s18 = smov [#allocation2]   ;;  %s19_s17 = int_to_ptr.hbm [resolvable:$true] %s18_s17 }
   0x3   :  { %s20_s19 = sshll.u32 %s1008_s18, 4  ;;  %s31_s22 = sshll.u32 %s1290_s2, 4  ;;  %s21_s19 = int_to_ptr.vmem [resolvable:$true] %s20_s19  ;;  %s32_s22 = int_to_ptr.hbm [resolvable:$true] %s31_s22 }
   0x4   :  { %s1009_s23 = smov 128   ;;  %s1010_s24 = smov 8  }
   0x5   :  { %26 = dma.hbm_to_vmem [thread:$0]  %s19_s17, 3840, %s21_s19, [#allocation3], %s1009_s23, %s1009_s23, %s1010_s24  }
   0x6   :  { %s1011_s25 = smov [#allocation5]  }
   0x7   :  { %s33_s26 = sshll.u32 %s1011_s25, 4  ;;  %s34_s26 = int_to_ptr.vmem [resolvable:$true] %s33_s26 }
   0x8   :  { %39 = dma.hbm_to_vmem [thread:$0]  %s32_s22, 1536, %s34_s26, [#allocation6], %s1009_s23, %s1009_s23, %s1010_s24  }
   0x9   :  { %1002 = dma.done.wait [#allocation3], 3840  }
   0xa   :  { %1003 = vsyncadd [#allocation3], 4294963456 }
   0xb   :  { %1004 = dma.done.wait [#allocation6], 1536  }
   0xc   :  { %1005 = vsyncadd [#allocation6], 4294965760  ;;  %v1012_v0 = vmov 0.0   ;;  %vm188_vm0 = vcmask 64512   ;;  %v1048_v1 = vld [vmem:[#allocation5] sm:$0xff]  ;;  %v83_v2 = vld [vmem:[#allocation5 + $0x18] sm:$0xff] }
   0xd   :  { %210 = vmatpush.msra.mxu3 %v1012_v0  ;;  %128 = vmatpush.msra.mxu0 %v83_v2  ;;  %v82_v3 = vld [vmem:[#allocation5 + $0x10] sm:$0xff]  ;;  %v1052_v4 = vld [vmem:[#allocation5 + $0x8] sm:$0xff]  ;;  %vm101_vm1 = vcmask 130048   ;;  %v1060_v6 = vld [vmem:[#allocation2 + $0x68] sm:$0xff]  ;;  %s1013_s5 = smov 32   ;;  %s1014_s6 = smov 64  }
   0xe   :  { %846 = vmatmul.msk.f32.vlgmr.msra.gmra.mxu3 %vm188_vm0, %v1048_v1  ;;  %867 = vmatpush.msra.mxu1 %v83_v2  ;;  %v96_v5 = vld [vmem:[%s1288_s0] sm:$0xff]  ;;  %v97_v8 = vld [vmem:[%s1288_s0 + $0x8] sm:$0xff]  ;;  %v1069_v9 = vld [vmem:[#allocation2 + $0x58] sm:$0xff]  ;;  %vm226_vm2 = vcmask 261120   ;;  %vm228_vm3 = vcmask 523264   ;;  %vm230_vm4 = vcmask 785408  }
   0xf   :  { %129 = vmatpush.msra.mxu0 %v82_v3  ;;  %v1062_v7 = vld [vmem:[#allocation2 + $0x60] sm:$0xff]  ;;  %238 = vmatpush.msrb.mxu3 %v1060_v6  ;;  %v1074_v10 = vld [vmem:[#allocation2 + $0x50] sm:$0xff]  ;;  %v1078_v11 = vld [vmem:[#allocation2 + $0x48] sm:$0xff]  ;;  %s1016_s10 = smov [#allocation7]   ;;  %s827_s14 = sshll.u32 %s1292_s4, 4  ;;  %s828_s14 = int_to_ptr.hbm [resolvable:$true] %s827_s14 }
  0x10   :  { %868 = vmatpush.msra.mxu1 %v82_v3  ;;  %838 = vmatmul.msk.f32.vlgmr.msra.gmra.mxu0 %vm101_vm1, %v96_v5  ;;  %v98_v12 = vld [vmem:[%s1288_s0 + $0x10] sm:$0xff]  ;;  %v1085_v13 = vld [vmem:[#allocation2 + $0x40] sm:$0xff]  ;;  %v1089_v14 = vld [vmem:[#allocation2 + $0x38] sm:$0xff]  ;;  %s825_s11 = sshll.u32 %s1016_s10, 4  ;;  %s826_s11 = int_to_ptr.vmem [resolvable:$true] %s825_s11 }
  0x11   :  { %368 = vmatpush.msrb.mxu0 %v1060_v6  ;;  %239 = vmatpush.msrb.mxu3 %v1062_v7  ;;  %v1098_v17 = vld [vmem:[#allocation2 + $0x30] sm:$0xff]  ;;  %v1101_v18 = vld [vmem:[#allocation2 + $0x28] sm:$0xff]  ;;  %v1104_v19 = vld [vmem:[#allocation2 + $0x20] sm:$0xff] }
  0x12   :  { %v99_v20 = vld [vmem:[%s1288_s0 + $0x18] sm:$0xff]  ;;  %v1117_v22 = vld [vmem:[#allocation2 + $0x10] sm:$0xff]  ;;  %v1124_v23 = vld [vmem:[%s1291_s3] sm:$0xff]  ;;  %s1015_s3 = smov 96  }
  0x13   :  { %369 = vmatpush.msrb.mxu0 %v1062_v7  ;;  %240 = vmatpush.msrb.mxu3 %v1069_v9  ;;  %v1111_v21 = vld [vmem:[#allocation2 + $0x18] sm:$0xff]  ;;  %v100_v24 = vperm.slane %v1124_v23, 6  ;;  %v51_v25 = vld [vmem:[#allocation2 + $0x8] sm:$0xff]  ;;  %v50_v26 = vld [vmem:[#allocation2] sm:$0xff]  ;;  %v1148_v44 = vperm.slane %v1124_v23, 0  ;;  %v1153_v49 = vperm.slane %v1124_v23, 3 }
  0x14   :  { %841 = vmatmul.msk.f32.vlgmr.msra.gmra.mxu1 %vm101_vm1, %v99_v20 }
  0x15   :  { %370 = vmatpush.msrb.mxu0 %v1069_v9  ;;  %241 = vmatpush.msrb.mxu3 %v1074_v10  ;;  %v256_v50 = vmul.f32 0.0, %v1153_v49 }
  0x16   :  { %847 = vmatmul.msk.f32.gmra.mxu3 %vm188_vm0, %v1052_v4  ;;  %173 = vmatpush.msrb.mxu1 %v51_v25 }
  0x17   :  { %371 = vmatpush.msrb.mxu0 %v1074_v10  ;;  %242 = vmatpush.msrb.mxu3 %v1078_v11 }
  0x18   :  { %839 = vmatmul.msk.f32.gmra.mxu0 %vm101_vm1, %v97_v8  ;;  %174 = vmatpush.msrb.mxu1 %v50_v26 }
  0x19   :  { %372 = vmatpush.msrb.mxu0 %v1078_v11  ;;  %243 = vmatpush.msrb.mxu3 %v1085_v13 }
  0x1a   :  { %499 = vmatpush.msra.mxu1 %v1060_v6 }
  0x1b   :  { %373 = vmatpush.msrb.mxu0 %v1085_v13  ;;  %244 = vmatpush.msrb.mxu3 %v1089_v14 }
  0x1c   :  { %500 = vmatpush.msra.mxu1 %v1062_v7 }
  0x1d   :  { %374 = vmatpush.msrb.mxu0 %v1089_v14  ;;  %245 = vmatpush.msrb.mxu3 %v1098_v17 }
  0x1e   :  { %501 = vmatpush.msra.mxu1 %v1069_v9 }
  0x1f   :  { %375 = vmatpush.msrb.mxu0 %v1098_v17  ;;  %246 = vmatpush.msrb.mxu3 %v1101_v18 }
  0x20   :  { %840 = vmatmul.msk.f32.gmra.mxu0 %vm101_vm1, %v98_v12  ;;  %502 = vmatpush.msra.mxu1 %v1074_v10 }
  0x21   :  { %376 = vmatpush.msrb.mxu0 %v1101_v18  ;;  %247 = vmatpush.msrb.mxu3 %v1104_v19 }
  0x22   :  { %503 = vmatpush.msra.mxu1 %v1078_v11 }
  0x23   :  { %377 = vmatpush.msrb.mxu0 %v1104_v19  ;;  %248 = vmatpush.msrb.mxu3 %v1111_v21 }
  0x24   :  { %504 = vmatpush.msra.mxu1 %v1085_v13 }
  0x25   :  { %378 = vmatpush.msrb.mxu0 %v1111_v21  ;;  %249 = vmatpush.msrb.mxu3 %v1117_v22 }
  0x26   :  { %505 = vmatpush.msra.mxu1 %v1089_v14 }
  0x27   :  { %379 = vmatpush.msrb.mxu0 %v1117_v22 }
  0x28   :  { %506 = vmatpush.msra.mxu1 %v1098_v17 }
  0x2a   :  { %507 = vmatpush.msra.mxu1 %v1101_v18 }
  0x2c   :  { %508 = vmatpush.msra.mxu1 %v1104_v19 }
  0x2e   :  { %509 = vmatpush.msra.mxu1 %v1111_v21 }
  0x30   :  { %510 = vmatpush.msra.mxu1 %v1117_v22 }
  0x8d   :  { %v131_v27 = vpop.f32.mrf.mxu0 }
  0x8e   :  { %v132_v28 = vadd.f32 %v131_v27, %v100_v24 }
  0x90   :  { %v143_v29 = vmax.f32 %v132_v28, 0.0 }
  0x91   :  { %v212_v15 = vpop.f32.mrf.mxu3  ;;  %v140_v40 = vpop.f32.mrf.mxu1 }
  0x92   :  { %219 = vrot.lane.b32.xlu0 %v212_v15, %s1013_s5  ;;  %842 = vmatmul.msk.f32.vlgmr.msrb.gmra.mxu1 %vm101_vm1, %v143_v29  ;;  %v141_v41 = vadd.f32 %v140_v40, %v100_v24 }
  0x94   :  { %v146_v42 = vmax.f32 %v141_v41, 0.0 }
  0x95   :  { %v134_v30 = vpop.f32.mrf.mxu0 }
  0x96   :  { %v135_v31 = vadd.f32 %v134_v30, %v100_v24 }
  0x98   :  { %v144_v32 = vmax.f32 %v135_v31, 0.0 }
  0x99   :  { %v215_v16 = vpop.f32.mrf.mxu3 }
  0x9a   :  { %223 = vrot.lane.b32.xlu0 %v215_v16, %s1014_s6  ;;  %843 = vmatmul.msk.f32.gmra.mxu1 %vm101_vm1, %v144_v32  ;;  %v1164_v16 = vperm.slane %v1124_v23, 4 }
  0x9d   :  { %v137_v33 = vpop.f32.mrf.mxu0 }
  0x9e   :  { %v138_v34 = vadd.f32 %v137_v33, %v100_v24 }
  0xa0   :  { %v145_v36 = vmax.f32 %v138_v34, 0.0 }
  0xa2   :  { %844 = vmatmul.msk.f32.gmra.mxu1 %vm101_vm1, %v145_v36 }
  0xaa   :  { %845 = vmatmul.msk.f32.gmra.mxu1 %vm101_vm1, %v146_v42 }
 0x104   :  { %v220_v35 = vpop.permute.xlu0 %219 }
 0x105   :  { %v227_v37 = vsel %vm226_vm2, 0.0, %v220_v35 }
 0x10c   :  { %v224_v38 = vpop.permute.xlu0 %223 }
 0x10d   :  { %v229_v39 = vsel %vm228_vm3, %v227_v37, %v224_v38 }
 0x10e   :  { %848 = vmatmul.msk.f32.vlgmr.msrb.gmra.mxu3 %vm230_vm4, %v229_v39 }
 0x10f   :  { %v176_v43 = vpop.f32.mrf.mxu1 }
 0x191   :  { %v251_v45 = vpop.f32.mrf.mxu3 }
 0x192   :  { %v254_v46 = vadd.f32 %v251_v45, %v176_v43 }
 0x194   :  { %v255_v47 = vadd.f32 %v254_v46, %v1148_v44 }
 0x196   :  { %878 = vtanh.f32 %v255_v47  ;;  %v257_v51 = vadd.f32 %v256_v50, %v255_v47 }
 0x198   :  { %v849_v52 = vmul.f32 -1.442695, %v257_v51  ;;  %v179_v51 = vpop.f32.mrf.mxu1 }
 0x19a   :  { %880 = vpow2.f32 %v849_v52 }
 0x19c   :  { %v879_v48 = vpop.eup %878 }
 0x19d   :  { %280 = vrot.lane.b32.xlu1 %v879_v48, %s1014_s6 }
 0x1a0   :  { %v881_v53 = vpop.eup %880 }
 0x1a1   :  { %v261_v54 = vadd.f32 1.0, %v881_v53 }
 0x1a3   :  { %882 = vrcp.f32 %v261_v54  ;;  %v273_v60 = vand.u32 2147483648, %v261_v54  ;;  %vm267_vm6 = vweird.f32 %v261_v54  ;;  %v271_v61 = vand.u32 2147483647, %v261_v54 }
 0x1a5   :  { %v274_v63 = vor.u32 1.1754944e-38, %v273_v60  ;;  %vm272_vm8 = vcmp.eq.f32.partialorder %v271_v61, 8.507059e+37 }
 0x1a9   :  { %v883_v55 = vpop.eup %882 }
 0x1aa   :  { %v263_v56 = vmul.f32 %v883_v55, %v261_v54  ;;  %vm268_vm5 = vweird.f32 %v883_v55 }
 0x1ab   :  { %vm269_vm7 = vmor %vm267_vm6, %vm268_vm5 }
 0x1ac   :  { %v264_v57 = vsub.f32 1.0, %v263_v56 }
 0x1ae   :  { %v265_v58 = vmul.f32 %v883_v55, %v264_v57 }
 0x1b0   :  { %v266_v59 = vadd.f32 %v883_v55, %v265_v58 }
 0x1b2   :  { %v270_v62 = vsel %vm269_vm7, %v883_v55, %v266_v59 }
 0x1b3   :  { %v275_v2 = vsel %vm272_vm8, %v274_v63, %v270_v62 }
 0x1b4   :  { %v278_v5 = vmul.f32 0.0, %v275_v2 }
 0x20f   :  { %v281_v0 = vpop.permute.xlu1 %280 }
 0x210   :  { %v283_v3 = vmul.f32 %v281_v0, %v275_v2 }
 0x212   :  { %285 = vrot.lane.b32.xlu1 %v283_v3, %s1013_s5 }
 0x284   :  { %v286_v8 = vpop.permute.xlu1 %285 }
 0x285   :  { %v1157_v12 = vadd.f32 %v286_v8, %v278_v5 }
 0x287   :  { %884 = vtanh.f32 %v1157_v12  ;;  %290 = vrot.lane.b32.xlu2 %v1157_v12, %s1015_s3 }
 0x28d   :  { %v885_v15 = vpop.eup %884 }
 0x28e   :  { %320 = vrot.lane.b32.xlu0 %v885_v15, %s1014_s6 }
 0x2e1   :  { %v291_v20 = vpop.permute.xlu2 %290 }
 0x2e2   :  { %v293_v24 = vmul.f32 %v291_v20, %v1164_v16  ;;  %v386_v56 = vsel %vm226_vm2, %v291_v20, %v1157_v12 }
 0x2e3   :  { %v387_v57 = vmul.f32 %v386_v56, %v1153_v49 }
 0x2e4   :  { %295 = vrot.lane.b32.xlu2 %v293_v24, %s1015_s3 }
 0x300   :  { %v321_v39 = vpop.permute.xlu0 %320 }
 0x33e   :  { %v296_v25 = vpop.permute.xlu2 %295 }
 0x33f   :  { %v298_v26 = vadd.f32 %v296_v25, %v255_v47 }
 0x341   :  { %v850_v27 = vmul.f32 -1.442695, %v298_v26 }
 0x343   :  { %886 = vpow2.f32 %v850_v27 }
 0x349   :  { %v887_v28 = vpop.eup %886 }
 0x34a   :  { %v302_v29 = vadd.f32 1.0, %v887_v28 }
 0x34c   :  { %888 = vrcp.f32 %v302_v29  ;;  %v314_v33 = vand.u32 2147483648, %v302_v29  ;;  %v312_v35 = vand.u32 2147483647, %v302_v29  ;;  %vm308_vm10 = vweird.f32 %v302_v29 }
 0x34e   :  { %v315_v37 = vor.u32 1.1754944e-38, %v314_v33  ;;  %vm313_vm12 = vcmp.eq.f32.partialorder %v312_v35, 8.507059e+37 }
 0x352   :  { %v889_v30 = vpop.eup %888 }
 0x353   :  { %v304_v31 = vmul.f32 %v889_v30, %v302_v29  ;;  %vm309_vm9 = vweird.f32 %v889_v30 }
 0x354   :  { %vm310_vm11 = vmor %vm308_vm10, %vm309_vm9 }
 0x355   :  { %v305_v32 = vsub.f32 1.0, %v304_v31 }
 0x357   :  { %v306_v34 = vmul.f32 %v889_v30, %v305_v32 }
 0x359   :  { %v307_v36 = vadd.f32 %v889_v30, %v306_v34 }
 0x35b   :  { %v311_v38 = vsel %vm310_vm11, %v889_v30, %v307_v36 }
 0x35c   :  { %v316_v40 = vsel %vm313_vm12, %v315_v37, %v311_v38 }
 0x35d   :  { %v323_v41 = vmul.f32 %v321_v39, %v316_v40 }
 0x35f   :  { %325 = vrot.lane.b32.xlu1 %v323_v41, %s1013_s5 }
 0x3d1   :  { %v1169_v42 = vpop.permute.xlu1 %325 }
 0x3d2   :  { %343 = vmatpush.msra.mxu2 %v1169_v42 }
 0x3d3   :  { %851 = vmatmul.msk.f32.vlgmr.msra.gmra.mxu2 %vm188_vm0, %v1048_v1 }
 0x3db   :  { %852 = vmatmul.msk.f32.gmra.mxu2 %vm188_vm0, %v1052_v4 }
 0x456   :  { %v345_v43 = vpop.f32.mrf.mxu2 }
 0x457   :  { %352 = vrot.lane.b32.xlu2 %v345_v43, %s1013_s5 }
 0x45e   :  { %v348_v45 = vpop.f32.mrf.mxu2 }
 0x45f   :  { %356 = vrot.lane.b32.xlu0 %v348_v45, %s1014_s6 }
 0x4b1   :  { %v353_v46 = vpop.permute.xlu2 %352 }
 0x4b2   :  { %v359_v47 = vsel %vm226_vm2, %v1169_v42, %v353_v46 }
 0x4d1   :  { %v357_v48 = vpop.permute.xlu0 %356 }
 0x4d2   :  { %v360_v50 = vsel %vm228_vm3, %v359_v47, %v357_v48 }
 0x4d3   :  { %853 = vmatmul.msk.f32.vlgmr.msrb.gmra.mxu0 %vm230_vm4, %v360_v50 }
 0x550   :  { %v381_v52 = vpop.f32.mrf.mxu0 }
 0x551   :  { %v384_v53 = vadd.f32 %v381_v52, %v179_v51 }
 0x553   :  { %v385_v54 = vadd.f32 %v384_v53, %v1148_v44 }
 0x555   :  { %890 = vtanh.f32 %v385_v54  ;;  %v388_v58 = vadd.f32 %v387_v57, %v385_v54 }
 0x557   :  { %v854_v59 = vmul.f32 -1.442695, %v388_v58 }
 0x559   :  { %892 = vpow2.f32 %v854_v59 }
 0x55b   :  { %v891_v55 = vpop.eup %890 }
 0x55c   :  { %411 = vrot.lane.b32.xlu1 %v891_v55, %s1014_s6 }
 0x55f   :  { %v893_v60 = vpop.eup %892 }
 0x560   :  { %v392_v61 = vadd.f32 1.0, %v893_v60 }
 0x562   :  { %894 = vrcp.f32 %v392_v61  ;;  %v404_v5 = vand.u32 2147483648, %v392_v61  ;;  %vm398_vm14 = vweird.f32 %v392_v61  ;;  %v402_v8 = vand.u32 2147483647, %v392_v61 }
 0x564   :  { %v405_v20 = vor.u32 1.1754944e-38, %v404_v5  ;;  %vm403_vm1 = vcmp.eq.f32.partialorder %v402_v8, 8.507059e+37 }
 0x568   :  { %v895_v62 = vpop.eup %894 }
 0x569   :  { %v394_v63 = vmul.f32 %v895_v62, %v392_v61  ;;  %vm399_vm13 = vweird.f32 %v895_v62 }
 0x56a   :  { %vm400_vm15 = vmor %vm398_vm14, %vm399_vm13 }
 0x56b   :  { %v395_v0 = vsub.f32 1.0, %v394_v63 }
 0x56d   :  { %v396_v2 = vmul.f32 %v895_v62, %v395_v0 }
 0x56f   :  { %v397_v3 = vadd.f32 %v895_v62, %v396_v2 }
 0x571   :  { %v401_v15 = vsel %vm400_vm15, %v895_v62, %v397_v3 }
 0x572   :  { %v406_v25 = vsel %vm403_vm1, %v405_v20, %v401_v15 }
 0x573   :  { %v409_v27 = vmul.f32 %v406_v25, %v1157_v12 }
 0x5ce   :  { %v412_v24 = vpop.permute.xlu1 %411 }
 0x5cf   :  { %v414_v26 = vmul.f32 %v412_v24, %v406_v25 }
 0x5d1   :  { %416 = vrot.lane.b32.xlu2 %v414_v26, %s1013_s5 }
 0x62b   :  { %v417_v28 = vpop.permute.xlu2 %416 }
 0x62c   :  { %v1189_v29 = vadd.f32 %v417_v28, %v409_v27 }
 0x62e   :  { %896 = vtanh.f32 %v1189_v29  ;;  %421 = vrot.lane.b32.xlu0 %v1189_v29, %s1015_s3 }
 0x634   :  { %v897_v30 = vpop.eup %896 }
 0x635   :  { %451 = vrot.lane.b32.xlu2 %v897_v30, %s1014_s6 }
 0x68f   :  { %v452_v48 = vpop.permute.xlu2 %451 }
 0x6a0   :  { %v422_v31 = vpop.permute.xlu0 %421 }
 0x6a1   :  { %v424_v32 = vmul.f32 %v422_v31, %v1164_v16  ;;  %v517_v53 = vsel %vm226_vm2, %v422_v31, %v1189_v29 }
 0x6a3   :  { %426 = vrot.lane.b32.xlu1 %v424_v32, %s1015_s3 }
 0x715   :  { %v427_v33 = vpop.permute.xlu1 %426 }
 0x716   :  { %v429_v34 = vadd.f32 %v427_v33, %v385_v54  ;;  %v518_v54 = vmul.f32 %v517_v53, %v1153_v49 }
 0x718   :  { %v855_v35 = vmul.f32 -1.442695, %v429_v34 }
 0x71a   :  { %898 = vpow2.f32 %v855_v35 }
 0x720   :  { %v899_v12 = vpop.eup %898 }
 0x721   :  { %v433_v36 = vadd.f32 1.0, %v899_v12 }
 0x723   :  { %900 = vrcp.f32 %v433_v36  ;;  %v445_v40 = vand.u32 2147483648, %v433_v36  ;;  %v443_v43 = vand.u32 2147483647, %v433_v36  ;;  %vm439_vm6 = vweird.f32 %v433_v36 }
 0x725   :  { %v446_v46 = vor.u32 1.1754944e-38, %v445_v40  ;;  %vm444_vm8 = vcmp.eq.f32.partialorder %v443_v43, 8.507059e+37 }
 0x729   :  { %v901_v37 = vpop.eup %900 }
 0x72a   :  { %v435_v38 = vmul.f32 %v901_v37, %v433_v36  ;;  %vm440_vm5 = vweird.f32 %v901_v37 }
 0x72b   :  { %vm441_vm7 = vmor %vm439_vm6, %vm440_vm5 }
 0x72c   :  { %v436_v39 = vsub.f32 1.0, %v435_v38 }
 0x72e   :  { %v437_v41 = vmul.f32 %v901_v37, %v436_v39 }
 0x730   :  { %v438_v45 = vadd.f32 %v901_v37, %v437_v41 }
 0x732   :  { %v442_v47 = vsel %vm441_vm7, %v901_v37, %v438_v45 }
 0x733   :  { %v447_v50 = vsel %vm444_vm8, %v446_v46, %v442_v47 }
 0x734   :  { %v1197_v51 = vmul.f32 %v452_v48, %v447_v50 }
 0x736   :  { %456 = vrot.lane.b32.xlu0 %v1197_v51, %s1013_s5 }
 0x7a8   :  { %v457_v52 = vpop.permute.xlu0 %456 }
 0x7a9   :  { %474 = vmatpush.msra.mxu3 %v457_v52 }
 0x7aa   :  { %856 = vmatmul.msk.f32.vlgmr.msra.gmra.mxu3 %vm188_vm0, %v1048_v1 }
 0x7ab   :  { %630 = vmatpush.msrb.mxu3 %v1060_v6 }
 0x7ad   :  { %631 = vmatpush.msrb.mxu3 %v1062_v7 }
 0x7af   :  { %632 = vmatpush.msrb.mxu3 %v1069_v9 }
 0x7b1   :  { %633 = vmatpush.msrb.mxu3 %v1074_v10 }
 0x7b2   :  { %857 = vmatmul.msk.f32.gmra.mxu3 %vm188_vm0, %v1052_v4 }
 0x7b3   :  { %634 = vmatpush.msrb.mxu3 %v1078_v11 }
 0x7b5   :  { %635 = vmatpush.msrb.mxu3 %v1085_v13 }
 0x7b7   :  { %636 = vmatpush.msrb.mxu3 %v1089_v14  ;;  %v182_v14 = vpop.f32.mrf.mxu1 }
 0x7b9   :  { %637 = vmatpush.msrb.mxu3 %v1098_v17 }
 0x7bb   :  { %638 = vmatpush.msrb.mxu3 %v1101_v18 }
 0x7bd   :  { %639 = vmatpush.msrb.mxu3 %v1104_v19 }
 0x7bf   :  { %640 = vmatpush.msrb.mxu3 %v1111_v21  ;;  %v1222_v17 = vpop.f32.mrf.mxu1 }
 0x7c1   :  { %641 = vmatpush.msrb.mxu3 %v1117_v22 }
 0x82d   :  { %v476_v6 = vpop.f32.mrf.mxu3 }
 0x82e   :  { %483 = vrot.lane.b32.xlu1 %v476_v6, %s1013_s5 }
 0x835   :  { %v479_v7 = vpop.f32.mrf.mxu3 }
 0x836   :  { %487 = vrot.lane.b32.xlu2 %v479_v7, %s1014_s6 }
 0x890   :  { %v488_v9 = vpop.permute.xlu2 %487 }
 0x8a0   :  { %v484_v10 = vpop.permute.xlu1 %483 }
 0x8a1   :  { %v490_v11 = vsel %vm226_vm2, %v457_v52, %v484_v10 }
 0x8a2   :  { %v491_v13 = vsel %vm228_vm3, %v490_v11, %v488_v9 }
 0x8a3   :  { %858 = vmatmul.msk.f32.vlgmr.msra.gmra.mxu1 %vm230_vm4, %v491_v13 }
 0x920   :  { %v512_v18 = vpop.f32.mrf.mxu1 }
 0x921   :  { %v515_v19 = vadd.f32 %v512_v18, %v182_v14 }
 0x923   :  { %v516_v21 = vadd.f32 %v515_v19, %v1148_v44 }
 0x925   :  { %902 = vtanh.f32 %v516_v21  ;;  %v519_v55 = vadd.f32 %v518_v54, %v516_v21 }
 0x927   :  { %v859_v56 = vmul.f32 -1.442695, %v519_v55 }
 0x929   :  { %904 = vpow2.f32 %v859_v56 }
 0x92b   :  { %v903_v22 = vpop.eup %902 }
 0x92c   :  { %542 = vrot.lane.b32.xlu0 %v903_v22, %s1014_s6 }
 0x92f   :  { %v905_v57 = vpop.eup %904 }
 0x930   :  { %v523_v58 = vadd.f32 1.0, %v905_v57 }
 0x932   :  { %906 = vrcp.f32 %v523_v58  ;;  %v535_v0 = vand.u32 2147483648, %v523_v58  ;;  %vm529_vm10 = vweird.f32 %v523_v58  ;;  %v533_v2 = vand.u32 2147483647, %v523_v58 }
 0x934   :  { %v536_v5 = vor.u32 1.1754944e-38, %v535_v0  ;;  %vm534_vm12 = vcmp.eq.f32.partialorder %v533_v2, 8.507059e+37 }
 0x938   :  { %v907_v59 = vpop.eup %906 }
 0x939   :  { %v525_v60 = vmul.f32 %v907_v59, %v523_v58  ;;  %vm530_vm9 = vweird.f32 %v907_v59 }
 0x93a   :  { %vm531_vm11 = vmor %vm529_vm10, %vm530_vm9 }
 0x93b   :  { %v526_v61 = vsub.f32 1.0, %v525_v60 }
 0x93d   :  { %v527_v62 = vmul.f32 %v907_v59, %v526_v61 }
 0x93f   :  { %v528_v63 = vadd.f32 %v907_v59, %v527_v62 }
 0x941   :  { %v532_v3 = vsel %vm531_vm11, %v907_v59, %v528_v63 }
 0x942   :  { %v537_v15 = vsel %vm534_vm12, %v536_v5, %v532_v3 }
 0x943   :  { %v540_v24 = vmul.f32 %v537_v15, %v1189_v29 }
 0x99e   :  { %v543_v8 = vpop.permute.xlu0 %542 }
 0x99f   :  { %v545_v20 = vmul.f32 %v543_v8, %v537_v15  ;;  %v79_v15 = vld [vmem:[#allocation2 + $0xe8] sm:$0xff] }
 0x9a0   :  { %748 = vmatpush.msra.mxu0 %v79_v15 }
 0x9a1   :  { %547 = vrot.lane.b32.xlu1 %v545_v20, %s1013_s5  ;;  %v78_v20 = vld [vmem:[#allocation2 + $0xe0] sm:$0xff] }
 0x9a2   :  { %749 = vmatpush.msra.mxu0 %v78_v20 }
 0xa13   :  { %v548_v25 = vpop.permute.xlu1 %547 }
 0xa14   :  { %v1231_v26 = vadd.f32 %v548_v25, %v540_v24  ;;  %v77_v24 = vld [vmem:[#allocation2 + $0xd8] sm:$0xff]  ;;  %v76_v25 = vld [vmem:[#allocation2 + $0xd0] sm:$0xff] }
 0xa15   :  { %750 = vmatpush.msra.mxu0 %v77_v24 }
 0xa16   :  { %908 = vtanh.f32 %v1231_v26  ;;  %552 = vrot.lane.b32.xlu2 %v1231_v26, %s1015_s3 }
 0xa17   :  { %751 = vmatpush.msra.mxu0 %v76_v25 }
 0xa1c   :  { %v909_v27 = vpop.eup %908 }
 0xa1d   :  { %582 = vrot.lane.b32.xlu1 %v909_v27, %s1014_s6  ;;  %v72_v27 = vld [vmem:[#allocation2 + $0xb0] sm:$0xff] }
 0xa70   :  { %v553_v28 = vpop.permute.xlu2 %552 }
 0xa71   :  { %v555_v30 = vmul.f32 %v553_v28, %v1164_v16  ;;  %v648_v14 = vsel %vm226_vm2, %v553_v28, %v1231_v26  ;;  %v71_v28 = vld [vmem:[#allocation2 + $0xa8] sm:$0xff] }
 0xa72   :  { %v649_v18 = vmul.f32 %v648_v14, %v1153_v49 }
 0xa73   :  { %557 = vrot.lane.b32.xlu0 %v555_v30, %s1015_s3  ;;  %v70_v30 = vld [vmem:[#allocation2 + $0xa0] sm:$0xff] }
 0xa8f   :  { %v583_v45 = vpop.permute.xlu1 %582 }
 0xae5   :  { %v558_v31 = vpop.permute.xlu0 %557 }
 0xae6   :  { %v560_v32 = vadd.f32 %v558_v31, %v516_v21  ;;  %v69_v31 = vld [vmem:[#allocation2 + $0x98] sm:$0xff] }
 0xae8   :  { %v860_v33 = vmul.f32 -1.442695, %v560_v32  ;;  %v68_v32 = vld [vmem:[#allocation2 + $0x90] sm:$0xff] }
 0xaea   :  { %910 = vpow2.f32 %v860_v33  ;;  %v67_v33 = vld [vmem:[#allocation2 + $0x88] sm:$0xff] }
 0xaf0   :  { %v911_v29 = vpop.eup %910 }
 0xaf1   :  { %v564_v34 = vadd.f32 1.0, %v911_v29  ;;  %v66_v29 = vld [vmem:[#allocation2 + $0x80] sm:$0xff] }
 0xaf3   :  { %912 = vrcp.f32 %v564_v34  ;;  %v576_v37 = vand.u32 2147483648, %v564_v34  ;;  %v574_v39 = vand.u32 2147483647, %v564_v34  ;;  %vm570_vm14 = vweird.f32 %v564_v34 }
 0xaf5   :  { %v577_v41 = vor.u32 1.1754944e-38, %v576_v37  ;;  %vm575_vm1 = vcmp.eq.f32.partialorder %v574_v39, 8.507059e+37  ;;  %v91_v37 = vld [vmem:[#allocation5 + $0x58] sm:$0xff] }
 0xaf6   :  { %800 = vmatpush.msrb.mxu1 %v91_v37 }
 0xaf9   :  { %v913_v35 = vpop.eup %912 }
 0xafa   :  { %v566_v12 = vmul.f32 %v913_v35, %v564_v34  ;;  %vm571_vm13 = vweird.f32 %v913_v35  ;;  %v65_v34 = vld [vmem:[#allocation2 + $0x78] sm:$0xff] }
 0xafb   :  { %vm572_vm15 = vmor %vm570_vm14, %vm571_vm13 }
 0xafc   :  { %v567_v36 = vsub.f32 1.0, %v566_v12 }
 0xafe   :  { %v568_v38 = vmul.f32 %v913_v35, %v567_v36 }
 0xb00   :  { %v569_v40 = vadd.f32 %v913_v35, %v568_v38  ;;  %v90_v38 = vld [vmem:[#allocation5 + $0x50] sm:$0xff] }
 0xb01   :  { %801 = vmatpush.msrb.mxu1 %v90_v38 }
 0xb02   :  { %v573_v43 = vsel %vm572_vm15, %v913_v35, %v569_v40  ;;  %v64_v35 = vld [vmem:[#allocation2 + $0x70] sm:$0xff]  ;;  %v89_v40 = vld [vmem:[#allocation5 + $0x48] sm:$0xff] }
 0xb03   :  { %v578_v46 = vsel %vm575_vm1, %v577_v41, %v573_v43  ;;  %v88_v41 = vld [vmem:[#allocation5 + $0x40] sm:$0xff]  ;;  %802 = vmatpush.msrb.mxu1 %v89_v40  ;;  %v87_v43 = vld [vmem:[#allocation5 + $0x38] sm:$0xff] }
 0xb04   :  { %v585_v47 = vmul.f32 %v583_v45, %v578_v46  ;;  %v86_v45 = vld [vmem:[#allocation5 + $0x30] sm:$0xff] }
 0xb05   :  { %803 = vmatpush.msrb.mxu1 %v88_v41 }
 0xb06   :  { %587 = vrot.lane.b32.xlu2 %v585_v47, %s1013_s5 }
 0xb07   :  { %804 = vmatpush.msrb.mxu1 %v87_v43 }
 0xb09   :  { %805 = vmatpush.msrb.mxu1 %v86_v45 }
 0xb60   :  { %v588_v48 = vpop.permute.xlu2 %587 }
 0xb61   :  { %605 = vmatpush.msrb.mxu2 %v588_v48 }
 0xb62   :  { %861 = vmatmul.msk.f32.vlgmr.msrb.gmra.mxu2 %vm188_vm0, %v1048_v1 }
 0xb63   :  { %726 = vmatpush.msra.mxu2 %v79_v15 }
 0xb65   :  { %727 = vmatpush.msra.mxu2 %v78_v20 }
 0xb67   :  { %728 = vmatpush.msra.mxu2 %v77_v24 }
 0xb69   :  { %729 = vmatpush.msra.mxu2 %v76_v25 }
 0xb6a   :  { %862 = vmatmul.msk.f32.gmra.mxu2 %vm188_vm0, %v1052_v4 }
 0xbe5   :  { %v607_v50 = vpop.f32.mrf.mxu2 }
 0xbe6   :  { %614 = vrot.lane.b32.xlu0 %v607_v50, %s1013_s5 }
 0xbed   :  { %v610_v52 = vpop.f32.mrf.mxu2 }
 0xbee   :  { %618 = vrot.lane.b32.xlu1 %v610_v52, %s1014_s6 }
 0xc58   :  { %v615_v6 = vpop.permute.xlu0 %614 }
 0xc59   :  { %v621_v7 = vsel %vm226_vm2, %v588_v48, %v615_v6  ;;  %v85_v48 = vld [vmem:[#allocation5 + $0x28] sm:$0xff] }
 0xc5a   :  { %806 = vmatpush.msrb.mxu1 %v85_v48 }
 0xc60   :  { %v619_v9 = vpop.permute.xlu1 %618 }
 0xc61   :  { %v622_v10 = vsel %vm228_vm3, %v621_v7, %v619_v9 }
 0xc62   :  { %863 = vmatmul.msk.f32.vlgmr.msrb.gmra.mxu3 %vm230_vm4, %v622_v10 }
 0xce5   :  { %v643_v11 = vpop.f32.mrf.mxu3 }
 0xce6   :  { %v646_v1 = vadd.f32 %v643_v11, %v1222_v17 }
 0xce8   :  { %v1251_v13 = vadd.f32 %v646_v1, %v1148_v44 }
 0xcea   :  { %914 = vtanh.f32 %v1251_v13  ;;  %v650_v19 = vadd.f32 %v649_v18, %v1251_v13 }
 0xcec   :  { %v864_v21 = vmul.f32 -1.442695, %v650_v19 }
 0xcee   :  { %916 = vpow2.f32 %v864_v21 }
 0xcf0   :  { %v915_v4 = vpop.eup %914 }
 0xcf1   :  { %673 = vrot.lane.b32.xlu2 %v915_v4, %s1014_s6 }
 0xcf4   :  { %v917_v22 = vpop.eup %916 }
 0xcf5   :  { %v654_v53 = vadd.f32 1.0, %v917_v22 }
 0xcf7   :  { %918 = vrcp.f32 %v654_v53  ;;  %v666_v57 = vand.u32 2147483648, %v654_v53  ;;  %vm660_vm5 = vweird.f32 %v654_v53  ;;  %v664_v58 = vand.u32 2147483647, %v654_v53 }
 0xcf9   :  { %v667_v60 = vor.u32 1.1754944e-38, %v666_v57  ;;  %vm665_vm7 = vcmp.eq.f32.partialorder %v664_v58, 8.507059e+37 }
 0xcfd   :  { %v919_v17 = vpop.eup %918 }
 0xcfe   :  { %v656_v44 = vmul.f32 %v919_v17, %v654_v53  ;;  %vm661_vm0 = vweird.f32 %v919_v17 }
 0xcff   :  { %vm662_vm6 = vmor %vm660_vm5, %vm661_vm0 }
 0xd00   :  { %v657_v54 = vsub.f32 1.0, %v656_v44  ;;  %v84_v44 = vld [vmem:[#allocation5 + $0x20] sm:$0xff] }
 0xd01   :  { %807 = vmatpush.msrb.mxu1 %v84_v44 }
 0xd02   :  { %v658_v55 = vmul.f32 %v919_v17, %v657_v54 }
 0xd04   :  { %v659_v56 = vadd.f32 %v919_v17, %v658_v55 }
 0xd06   :  { %v663_v59 = vsel %vm662_vm6, %v919_v17, %v659_v56 }
 0xd07   :  { %v668_v61 = vsel %vm665_vm7, %v667_v60, %v663_v59  ;;  %v812_v59 = vlaneseq }
 0xd08   :  { %v671_v63 = vmul.f32 %v668_v61, %v1231_v26  ;;  %v73_v26 = vld [vmem:[#allocation2 + $0xb8] sm:$0xff] }
 0xd4b   :  { %v674_v49 = vpop.permute.xlu2 %673 }
 0xd4c   :  { %v676_v62 = vmul.f32 %v674_v49, %v668_v61  ;;  %v813_v61 = vand.u32 127, %v812_v59 }
 0xd4e   :  { %678 = vrot.lane.b32.xlu0 %v676_v62, %s1013_s5 }
 0xdc0   :  { %v679_v0 = vpop.permute.xlu0 %678 }
 0xdc1   :  { %v1261_v2 = vadd.f32 %v679_v0, %v671_v63 }
 0xdc3   :  { %920 = vtanh.f32 %v1261_v2  ;;  %683 = vrot.lane.b32.xlu1 %v1261_v2, %s1015_s3 }
 0xdc9   :  { %v921_v3 = vpop.eup %920 }
 0xdca   :  { %713 = vrot.lane.b32.xlu0 %v921_v3, %s1014_s6 }
 0xdcb   :  { %717 = vrot.lane.b32.xlu1 %v1197_v51, %s1014_s6  ;;  %v75_v51 = vld [vmem:[#allocation2 + $0xc8] sm:$0xff] }
 0xdcc   :  { %730 = vmatpush.msra.mxu2 %v75_v51  ;;  %752 = vmatpush.msra.mxu0 %v75_v51  ;;  %v779_v51 = vperm.slane %v1124_v23, 1 }
 0xe35   :  { %v684_v5 = vpop.permute.xlu1 %683 }
 0xe36   :  { %v686_v8 = vmul.f32 %v684_v5, %v1164_v16  ;;  %v74_v16 = vld [vmem:[#allocation2 + $0xc0] sm:$0xff] }
 0xe37   :  { %731 = vmatpush.msra.mxu2 %v74_v16  ;;  %753 = vmatpush.msra.mxu0 %v74_v16 }
 0xe38   :  { %688 = vrot.lane.b32.xlu2 %v686_v8, %s1015_s3 }
 0xe39   :  { %732 = vmatpush.msra.mxu2 %v73_v26  ;;  %754 = vmatpush.msra.mxu0 %v73_v26 }
 0xe3b   :  { %733 = vmatpush.msra.mxu2 %v72_v27  ;;  %755 = vmatpush.msra.mxu0 %v72_v27  ;;  %v781_v27 = vperm.slane %v1124_v23, 2 }
 0xe3c   :  { %v714_v18 = vpop.permute.xlu0 %713 }
 0xe3d   :  { %734 = vmatpush.msra.mxu2 %v71_v28  ;;  %756 = vmatpush.msra.mxu0 %v71_v28  ;;  %v718_v1 = vpop.permute.xlu1 %717 }
 0xe3e   :  { %v723_v21 = vsel %vm226_vm2, %v1169_v42, %v718_v1  ;;  %v788_v42 = vperm.slane %v1124_v23, 5 }
 0xe3f   :  { %735 = vmatpush.msra.mxu2 %v70_v30  ;;  %757 = vmatpush.msra.mxu0 %v70_v30 }
 0xe40   :  { %720 = vrot.lane.b32.xlu2 %v585_v47, %s1015_s3 }
 0xe41   :  { %736 = vmatpush.msra.mxu2 %v69_v31  ;;  %758 = vmatpush.msra.mxu0 %v69_v31 }
 0xe43   :  { %737 = vmatpush.msra.mxu2 %v68_v32  ;;  %759 = vmatpush.msra.mxu0 %v68_v32 }
 0xe45   :  { %738 = vmatpush.msra.mxu2 %v67_v33  ;;  %760 = vmatpush.msra.mxu0 %v67_v33 }
 0xe47   :  { %739 = vmatpush.msra.mxu2 %v66_v29  ;;  %761 = vmatpush.msra.mxu0 %v66_v29 }
 0xe49   :  { %740 = vmatpush.msra.mxu2 %v65_v34  ;;  %762 = vmatpush.msra.mxu0 %v65_v34 }
 0xe4b   :  { %741 = vmatpush.msra.mxu2 %v64_v35  ;;  %763 = vmatpush.msra.mxu0 %v64_v35 }
 0xe92   :  { %v689_v12 = vpop.permute.xlu2 %688 }
 0xe93   :  { %v691_v36 = vadd.f32 %v689_v12, %v1251_v13 }
 0xe95   :  { %v865_v39 = vmul.f32 -1.442695, %v691_v36 }
 0xe97   :  { %922 = vpow2.f32 %v865_v39 }
 0xe9a   :  { %v721_v4 = vpop.permute.xlu2 %720 }
 0xe9b   :  { %v724_v53 = vsel %vm228_vm3, %v723_v21, %v721_v4 }
 0xe9d   :  { %v923_v46 = vpop.eup %922 }
 0xe9e   :  { %v695_v47 = vadd.f32 1.0, %v923_v46 }
 0xea0   :  { %924 = vrcp.f32 %v695_v47  ;;  %v707_v7 = vand.u32 2147483648, %v695_v47  ;;  %v705_v10 = vand.u32 2147483647, %v695_v47  ;;  %vm701_vm9 = vweird.f32 %v695_v47 }
 0xea2   :  { %v708_v13 = vor.u32 1.1754944e-38, %v707_v7  ;;  %vm706_vm11 = vcmp.eq.f32.partialorder %v705_v10, 8.507059e+37 }
 0xea6   :  { %v925_v50 = vpop.eup %924 }
 0xea7   :  { %v697_v52 = vmul.f32 %v925_v50, %v695_v47  ;;  %vm702_vm8 = vweird.f32 %v925_v50 }
 0xea8   :  { %vm703_vm10 = vmor %vm701_vm9, %vm702_vm8 }
 0xea9   :  { %v698_v6 = vsub.f32 1.0, %v697_v52 }
 0xeab   :  { %v699_v9 = vmul.f32 %v925_v50, %v698_v6 }
 0xead   :  { %v700_v11 = vadd.f32 %v925_v50, %v699_v9 }
 0xeaf   :  { %v704_v14 = vsel %vm703_vm10, %v925_v50, %v700_v11 }
 0xeb0   :  { %v709_v19 = vsel %vm706_vm11, %v708_v13, %v704_v14 }
 0xeb1   :  { %v716_v22 = vmul.f32 %v714_v18, %v709_v19 }
 0xeb3   :  { %784 = vrot.lane.b32.xlu0 %v716_v22, %s1013_s5  ;;  %v725_v17 = vsel %vm230_vm4, %v724_v53, %v716_v22  ;;  %vm814_vm4 = vcmp.lt.s32.totalorder %v813_v61, 32 }
 0xeb4   :  { %742 = vmatmul.f32.vlgmr.msra.gmra.mxu2 %v725_v17 }
 0xf25   :  { %v785_v54 = vpop.permute.xlu0 %784 }
 0xf26   :  { %v787_v55 = vsel %vm226_vm2, %v785_v54, %v1261_v2 }
 0xf27   :  { %866 = vmatmul.msk.f32.vlgmr.msrb.gmra.mxu1 %vm228_vm3, %v787_v55 }
 0xf37   :  { %v743_v56 = vpop.f32.mrf.mxu2 }
 0xf38   :  { %v746_v57 = vsub.f32 %v725_v17, %v743_v56 }
 0xf3a   :  { %v747_v58 = vmul.f32 %v746_v57, %v746_v57 }
 0xf3c   :  { %764 = vmatmul.f32.vlgmr.msra.gmra.mxu0 %v747_v58 }
 0xfa4   :  { %v809_v60 = vpop.f32.mrf.mxu1 }
 0xfa5   :  { %v810_v49 = vadd.f32 %v809_v60, %v788_v42 }
 0xfa7   :  { %926 = vtanh.f32 %v810_v49 }
 0xfad   :  { %v927_v62 = vpop.eup %926 }
 0xfae   :  { %v816_v63 = vsel %vm814_vm4, %v927_v62, %v810_v49 }
 0xfaf   :  { %v817_v0 = vsel %vm228_vm3, %v816_v63, 0.0 }
 0xfb0   :  { %819 = vst [vmem:[#allocation7 + $0x8] sm:$0xff] %v817_v0 }
 0xfb9   :  { %v765_v2 = vpop.f32.mrf.mxu0 }
 0xfba   :  { %v766_v3 = vadd.f32 1e-05, %v765_v2 }
 0xfbc   :  { %928 = vrsqrt.f32 %v766_v3  ;;  %vm774_vm12 = vweird.f32 %v766_v3 }
 0xfc2   :  { %v929_v5 = vpop.eup %928 }
 0xfc3   :  { %v769_v8 = vmul.f32 %v929_v5, %v766_v3  ;;  %vm775_vm2 = vweird.f32 %v929_v5 }
 0xfc4   :  { %vm776_vm13 = vmor %vm774_vm12, %vm775_vm2 }
 0xfc5   :  { %v770_v15 = vmul.f32 %v929_v5, %v769_v8 }
 0xfc7   :  { %v771_v20 = vmul.f32 0.5, %v770_v15 }
 0xfc9   :  { %v772_v24 = vsub.f32 1.5, %v771_v20 }
 0xfcb   :  { %v773_v25 = vmul.f32 %v929_v5, %v772_v24 }
 0xfcd   :  { %v777_v16 = vsel %vm776_vm13, %v929_v5, %v773_v25 }
 0xfce   :  { %v778_v26 = vmul.f32 %v777_v16, %v746_v57 }
 0xfd0   :  { %v780_v28 = vmul.f32 %v779_v51, %v778_v26 }
 0xfd2   :  { %v782_v30 = vadd.f32 %v781_v27, %v780_v28 }
 0xfd4   :  { %818 = vst [vmem:[#allocation7] sm:$0xff] %v782_v30 }
 0xfd5   :  { %830 = dma.vmem_to_hbm [thread:$0]  %s826_s11, 256, %s828_s14, [#allocation4]  }
 0xfd6   :  { %1006 = dma.done.wait [#allocation4], 256  }
 0xfd7   :  { %1007 = vsyncadd [#allocation4], 4294967040 }
 0xfd8   :  { %835 = vsyncpa [#allocation3], 1 }
 0xfd9   :  { %836 = vsyncpa [#allocation6], 1 }
 0xfda   :  { %837 = vsyncpa [#allocation4], 1 }

</bundles_post_ra>
